<compile_context>
chip_gen: v5e
topology: v5e:2x2
jax: 0.10.0
libtpu: 0.0.40
codegen_flags: <defaults>
</compile_context>

<pallas_src>
import jax
import jax.numpy as jnp
from jax import lax
from jax.experimental import pallas as pl
from jax.experimental.pallas import tpu as pltpu


def _round_up(x, m):
    return ((x + m - 1) // m) * m


def tri_head_q_fused_kernel(obs_ref, act_ref,
                            w1o_ref, w1a_ref, b1_ref,
                            w2_ref, b2_ref,
                            w3t_ref, b3_ref,
                            out_ref):
    # Layer 1: obs @ W_obs + action @ W_act + b1  (replaces torch.cat([obs, act], 1)).
    h = (jnp.dot(obs_ref[...], w1o_ref[...], preferred_element_type=jnp.float32)
         + jnp.dot(act_ref[...], w1a_ref[...], preferred_element_type=jnp.float32)
         + b1_ref[...])
    h = jnp.maximum(h, 0.0)

    # Layer 2: block-diagonal (lane-padded) weight keeps the two heads independent.
    h = jnp.dot(h, w2_ref[...], preferred_element_type=jnp.float32) + b2_ref[...]
    h = jnp.maximum(h, 0.0)

    # Output layer, produced transposed: out_t[o, b] = sum_k w3t[o, k] * h[b, k].
    # Batch lands on the lane axis -> lane-dense stores; row 0 is q1, row 1 is q2.
    out_t = lax.dot_general(
        w3t_ref[...], h,
        dimension_numbers=(((1,), (1,)), ((), ())),
        preferred_element_type=jnp.float32) + b3_ref[...]
    out_ref[...] = out_t.astype(out_ref.dtype)


def init_linear_params(key, in_features, out_features, dtype=jnp.float32):
    """Deterministic init mimicking PyTorch nn.Linear (uniform +/- 1/sqrt(in))."""
    kw, kb = jax.random.split(key)
    bound = 1.0 / (in_features ** 0.5)
    # Store weight as [in, out] (transposed vs torch [out, in]) so we can do x @ W.
    w = jax.random.uniform(kw, (in_features, out_features), dtype, -bound, bound)
    b = jax.random.uniform(kb, (1, out_features), dtype, -bound, bound)
    return w, b


def pack_params(raw_params, state_dim):
    """Fuse the two Q-heads into one lane-padded packed parameter set (host-side)."""
    (w1f1, b1f1, w1f2, b1f2, w1out, b1out,
     w2f1, b2f1, w2f2, b2f2, w2out, b2out) = raw_params

    H = w1f1.shape[1]
    Hp = _round_up(2 * H, 128)              # lane-aligned fused hidden width
    dt = w1f1.dtype
    pad = Hp - 2 * H

    # Layer 1: [in, 2H] -> pad cols to Hp, then split rows into obs / action parts.
    w1 = jnp.pad(jnp.concatenate([w1f1, w2f1], axis=1), ((0, 0), (0, pad)))
    w1_obs = w1[:state_dim, :]
    w1_act = w1[state_dim:, :]
    b1 = jnp.pad(jnp.concatenate([b1f1, b2f1], axis=1), ((0, 0), (0, pad)))

    # Layer 2: block-diagonal [2H, 2H] embedded in zeros [Hp, Hp].
    w2 = jnp.zeros((Hp, Hp), dt)
    w2 = w2.at[:H, :H].set(w1f2)
    w2 = w2.at[H:2 * H, H:2 * H].set(w2f2)
    b2 = jnp.pad(jnp.concatenate([b1f2, b2f2], axis=1), ((0, 0), (0, pad)))

    # Output layer, stored already transposed: [2, Hp]; row 0 = q1, row 1 = q2.
    w3t = jnp.zeros((2, Hp), dt)
    w3t = w3t.at[0, :H].set(w1out[:, 0])
    w3t = w3t.at[1, H:2 * H].set(w2out[:, 0])
    b3 = jnp.concatenate([b1out, b2out], axis=1).T   # [2, 1]

    return (w1_obs, w1_act, b1, w2, b2, w3t, b3)


def make_tri_head_q(state_dim, action_dim, hidden_size, key):
    keys = jax.random.split(key, 6)
    in_dim = state_dim + action_dim
    raw_params = (
        *init_linear_params(keys[0], in_dim, hidden_size),       # q1f1
        *init_linear_params(keys[1], hidden_size, hidden_size),  # q1f2
        *init_linear_params(keys[2], hidden_size, 1),            # q1out
        *init_linear_params(keys[3], in_dim, hidden_size),       # q2f1
        *init_linear_params(keys[4], hidden_size, hidden_size),  # q2f2
        *init_linear_params(keys[5], hidden_size, 1),            # q2out
    )
    packed = pack_params(raw_params, state_dim)

    @jax.jit
    def forward(obs, action):
        B = obs.shape[0]
        w1_obs, w1_act, b1, w2, b2, w3t, b3 = packed

        # Batch tiling: weights stay VMEM-resident across the grid (constant
        # index_map); batch axis is "parallel" for megacore sharding.
        TB = B if B <= 512 else 512
        grid = (pl.cdiv(B, TB),)

        def batch_map(i):
            return (i, 0)

        def resident_map(i):
            return (0, 0)

        def out_map(i):
            return (0, i)

        out = pl.pallas_call(
            tri_head_q_fused_kernel,
            out_shape=jax.ShapeDtypeStruct((2, B), obs.dtype),
            grid=grid,
            in_specs=[
                pl.BlockSpec((TB, state_dim), batch_map),     # obs
                pl.BlockSpec((TB, action_dim), batch_map),    # action
                pl.BlockSpec(w1_obs.shape, resident_map),     # W1 (obs rows)
                pl.BlockSpec(w1_act.shape, resident_map),     # W1 (action rows)
                pl.BlockSpec(b1.shape, resident_map),         # b1
                pl.BlockSpec(w2.shape, resident_map),         # W2 (blockdiag)
                pl.BlockSpec(b2.shape, resident_map),         # b2
                pl.BlockSpec(w3t.shape, resident_map),        # W3^T (blockdiag)
                pl.BlockSpec(b3.shape, resident_map),         # b3 [2, 1]
            ],
            out_specs=pl.BlockSpec((2, TB), out_map),
            compiler_params=pltpu.CompilerParams(
                dimension_semantics=("parallel",)),
        )(obs, action, w1_obs, w1_act, b1, w2, b2, w3t, b3)

        # Row 0 is q1, row 1 is q2; size-1 leading dim makes these free reshapes.
        q1 = out[0].reshape(B, 1)
        q2 = out[1].reshape(B, 1)
        # Match the PyTorch module's return signature: (q1, q2, None).
        return q1, q2, None

    return forward, raw_params


def reference_forward(obs, action, raw_params):
    (w1f1, b1f1, w1f2, b1f2, w1out, b1out,
     w2f1, b2f1, w2f2, b2f2, w2out, b2out) = raw_params
    s = jnp.concatenate([obs, action], axis=1)
    h = jnp.maximum(s @ w1f1 + b1f1, 0.0)
    h = jnp.maximum(h @ w1f2 + b1f2, 0.0)
    q1 = h @ w1out + b1out
    g = jnp.maximum(s @ w2f1 + b2f1, 0.0)
    g = jnp.maximum(g @ w2f2 + b2f2, 0.0)
    q2 = g @ w2out + b2out
    return q1, q2


if __name__ == "__main__":
    key = jax.random.PRNGKey(0)
    k_obs, k_act, k_params = jax.random.split(key, 3)

    batch = 8
    state_dim = 16
    action_dim = 8
    hidden_size = 32

    obs = jax.random.normal(k_obs, (batch, state_dim), jnp.float32)
    action = jax.random.normal(k_act, (batch, action_dim), jnp.float32)

    forward, raw_params = make_tri_head_q(state_dim, action_dim, hidden_size, k_params)

    q1, q2, extra = forward(obs, action)
    jax.block_until_ready((q1, q2))

    # Sanity-check against a pure-JAX reference of the unfused module.
    q1_ref, q2_ref = reference_forward(obs, action, raw_params)
    assert q1.shape == (batch, 1) and q2.shape == (batch, 1) and extra is None
    assert jnp.allclose(q1, q1_ref, atol=1e-5, rtol=1e-5)
    assert jnp.allclose(q2, q2_ref, atol=1e-5, rtol=1e-5)

    print("KERNEL_OK")
</pallas_src>

<mosaic_0001>
module attributes {stable_mosaic.version = 11 : i64} {
  func.func @tri_head_q_fused_kernel(%arg0: i32, %arg1: memref<8x16xf32, #tpu.memory_space<vmem>>, %arg2: memref<8x8xf32, #tpu.memory_space<vmem>>, %arg3: memref<16x128xf32, #tpu.memory_space<vmem>>, %arg4: memref<8x128xf32, #tpu.memory_space<vmem>>, %arg5: memref<1x128xf32, #tpu.memory_space<vmem>>, %arg6: memref<128x128xf32, #tpu.memory_space<vmem>>, %arg7: memref<1x128xf32, #tpu.memory_space<vmem>>, %arg8: memref<2x128xf32, #tpu.memory_space<vmem>>, %arg9: memref<2x1xf32, #tpu.memory_space<vmem>>, %arg10: memref<2x8xf32, #tpu.memory_space<vmem>>) attributes {dimension_semantics = [#tpu.dimension_semantics<parallel>], iteration_bounds = array<i64: 1>, scalar_prefetch = 0 : i64, scratch_operands = 0 : i64, tpu.core_type = #tpu.core_type<tc>, window_params = [{transform_indices = @transform_0, window_bounds = array<i64: 8, 16>}, {transform_indices = @transform_1, window_bounds = array<i64: 8, 8>}, {pipeline_mode = #tpu.pipeline_mode<synchronous>, transform_indices = @transform_2, window_bounds = array<i64: 16, 128>}, {pipeline_mode = #tpu.pipeline_mode<synchronous>, transform_indices = @transform_3, window_bounds = array<i64: 8, 128>}, {pipeline_mode = #tpu.pipeline_mode<synchronous>, transform_indices = @transform_4, window_bounds = array<i64: 1, 128>}, {pipeline_mode = #tpu.pipeline_mode<synchronous>, transform_indices = @transform_5, window_bounds = array<i64: 128, 128>}, {pipeline_mode = #tpu.pipeline_mode<synchronous>, transform_indices = @transform_6, window_bounds = array<i64: 1, 128>}, {pipeline_mode = #tpu.pipeline_mode<synchronous>, transform_indices = @transform_7, window_bounds = array<i64: 2, 128>}, {pipeline_mode = #tpu.pipeline_mode<synchronous>, transform_indices = @transform_8, window_bounds = array<i64: 2, 1>}, {transform_indices = @transform_9, window_bounds = array<i64: 2, 8>}]} {
    %c0 = arith.constant 0 : index
    %c0_0 = arith.constant 0 : index
    %0 = vector.load %arg1[%c0, %c0_0] : memref<8x16xf32, #tpu.memory_space<vmem>>, vector<8x16xf32>
    %c0_1 = arith.constant 0 : index
    %c0_2 = arith.constant 0 : index
    %1 = vector.load %arg3[%c0_1, %c0_2] : memref<16x128xf32, #tpu.memory_space<vmem>>, vector<16x128xf32>
    %cst = arith.constant dense<0.000000e+00> : vector<8x128xf32>
    %2 = tpu.matmul %0, %1, %cst {dimension_numbers = #tpu.dot_dimension_numbers<[1], [0], [0], [1], [0, 0, 1, 1], [], []>} : vector<8x16xf32>, vector<16x128xf32>, vector<8x128xf32> -> vector<8x128xf32>
    %c0_3 = arith.constant 0 : index
    %c0_4 = arith.constant 0 : index
    %3 = vector.load %arg2[%c0_3, %c0_4] : memref<8x8xf32, #tpu.memory_space<vmem>>, vector<8x8xf32>
    %c0_5 = arith.constant 0 : index
    %c0_6 = arith.constant 0 : index
    %4 = vector.load %arg4[%c0_5, %c0_6] : memref<8x128xf32, #tpu.memory_space<vmem>>, vector<8x128xf32>
    %cst_7 = arith.constant dense<0.000000e+00> : vector<8x128xf32>
    %5 = tpu.matmul %3, %4, %cst_7 {dimension_numbers = #tpu.dot_dimension_numbers<[1], [0], [0], [1], [0, 0, 1, 1], [], []>} : vector<8x8xf32>, vector<8x128xf32>, vector<8x128xf32> -> vector<8x128xf32>
    %6 = arith.addf %2, %5 : vector<8x128xf32>
    %c0_8 = arith.constant 0 : index
    %c0_9 = arith.constant 0 : index
    %7 = vector.load %arg5[%c0_8, %c0_9] : memref<1x128xf32, #tpu.memory_space<vmem>>, vector<1x128xf32>
    %8 = vector.broadcast %7 : vector<1x128xf32> to vector<8x128xf32>
    %9 = arith.addf %6, %8 : vector<8x128xf32>
    %cst_10 = arith.constant 0.000000e+00 : f32
    %10 = vector.broadcast %cst_10 : f32 to vector<8x128xf32>
    %11 = arith.maximumf %9, %10 : vector<8x128xf32>
    %c0_11 = arith.constant 0 : index
    %c0_12 = arith.constant 0 : index
    %12 = vector.load %arg6[%c0_11, %c0_12] : memref<128x128xf32, #tpu.memory_space<vmem>>, vector<128x128xf32>
    %cst_13 = arith.constant dense<0.000000e+00> : vector<8x128xf32>
    %13 = tpu.matmul %11, %12, %cst_13 {dimension_numbers = #tpu.dot_dimension_numbers<[1], [0], [0], [1], [0, 0, 1, 1], [], []>} : vector<8x128xf32>, vector<128x128xf32>, vector<8x128xf32> -> vector<8x128xf32>
    %c0_14 = arith.constant 0 : index
    %c0_15 = arith.constant 0 : index
    %14 = vector.load %arg7[%c0_14, %c0_15] : memref<1x128xf32, #tpu.memory_space<vmem>>, vector<1x128xf32>
    %15 = vector.broadcast %14 : vector<1x128xf32> to vector<8x128xf32>
    %16 = arith.addf %13, %15 : vector<8x128xf32>
    %cst_16 = arith.constant 0.000000e+00 : f32
    %17 = vector.broadcast %cst_16 : f32 to vector<8x128xf32>
    %18 = arith.maximumf %16, %17 : vector<8x128xf32>
    %c0_17 = arith.constant 0 : index
    %c0_18 = arith.constant 0 : index
    %19 = vector.load %arg8[%c0_17, %c0_18] : memref<2x128xf32, #tpu.memory_space<vmem>>, vector<2x128xf32>
    %cst_19 = arith.constant dense<0.000000e+00> : vector<2x8xf32>
    %20 = tpu.matmul %19, %18, %cst_19 {dimension_numbers = #tpu.dot_dimension_numbers<[1], [1], [0], [0], [0, 0, 1, 0], [], []>} : vector<2x128xf32>, vector<8x128xf32>, vector<2x8xf32> -> vector<2x8xf32>
    %c0_20 = arith.constant 0 : index
    %c0_21 = arith.constant 0 : index
    %21 = vector.load %arg9[%c0_20, %c0_21] : memref<2x1xf32, #tpu.memory_space<vmem>>, vector<2x1xf32>
    %22 = vector.broadcast %21 : vector<2x1xf32> to vector<2x8xf32>
    %23 = arith.addf %20, %22 : vector<2x8xf32>
    %c0_22 = arith.constant 0 : index
    %c0_23 = arith.constant 0 : index
    %24 = vector.load %arg10[%c0_22, %c0_23] : memref<2x8xf32, #tpu.memory_space<vmem>>, vector<2x8xf32>
    tpu.vector_store %arg10[%c0_22, %c0_23], %23 {strides = array<i32>} : memref<2x8xf32, #tpu.memory_space<vmem>>, vector<2x8xf32>,
    return
  }
  func.func @transform_0(%arg0: i32) -> (i32, i32) {
    %c0_i32 = arith.constant 0 : i32
    %c0_i32_0 = arith.constant 0 : i32
    return %arg0, %c0_i32 : i32, i32
  }
  func.func @transform_1(%arg0: i32) -> (i32, i32) {
    %c0_i32 = arith.constant 0 : i32
    %c0_i32_0 = arith.constant 0 : i32
    return %arg0, %c0_i32 : i32, i32
  }
  func.func @transform_2(%arg0: i32) -> (i32, i32) {
    %c0_i32 = arith.constant 0 : i32
    %c0_i32_0 = arith.constant 0 : i32
    %c0_i32_1 = arith.constant 0 : i32
    return %c0_i32, %c0_i32_0 : i32, i32
  }
  func.func @transform_3(%arg0: i32) -> (i32, i32) {
    %c0_i32 = arith.constant 0 : i32
    %c0_i32_0 = arith.constant 0 : i32
    %c0_i32_1 = arith.constant 0 : i32
    return %c0_i32, %c0_i32_0 : i32, i32
  }
  func.func @transform_4(%arg0: i32) -> (i32, i32) {
    %c0_i32 = arith.constant 0 : i32
    %c0_i32_0 = arith.constant 0 : i32
    %c0_i32_1 = arith.constant 0 : i32
    return %c0_i32, %c0_i32_0 : i32, i32
  }
  func.func @transform_5(%arg0: i32) -> (i32, i32) {
    %c0_i32 = arith.constant 0 : i32
    %c0_i32_0 = arith.constant 0 : i32
    %c0_i32_1 = arith.constant 0 : i32
    return %c0_i32, %c0_i32_0 : i32, i32
  }
  func.func @transform_6(%arg0: i32) -> (i32, i32) {
    %c0_i32 = arith.constant 0 : i32
    %c0_i32_0 = arith.constant 0 : i32
    %c0_i32_1 = arith.constant 0 : i32
    return %c0_i32, %c0_i32_0 : i32, i32
  }
  func.func @transform_7(%arg0: i32) -> (i32, i32) {
    %c0_i32 = arith.constant 0 : i32
    %c0_i32_0 = arith.constant 0 : i32
    %c0_i32_1 = arith.constant 0 : i32
    return %c0_i32, %c0_i32_0 : i32, i32
  }
  func.func @transform_8(%arg0: i32) -> (i32, i32) {
    %c0_i32 = arith.constant 0 : i32
    %c0_i32_0 = arith.constant 0 : i32
    %c0_i32_1 = arith.constant 0 : i32
    return %c0_i32, %c0_i32_0 : i32, i32
  }
  func.func @transform_9(%arg0: i32) -> (i32, i32) {
    %c0_i32 = arith.constant 0 : i32
    %c0_i32_0 = arith.constant 0 : i32
    return %c0_i32, %arg0 : i32, i32
  }
}

</mosaic_0001>

<bundles_post_ra>
// kernel: forward.1
= control target key start
LH: loop header
LB: loop body
LE: loop exit
PB: predicated region body
PF: predicated region fallthrough
CT: control target
= control target key end

     0   :  { %14 = vsyncpa [#allocation3], 0  ;;  %s510_s0 = inlined_call_operand.hbm [shape: f32[8,16], index: 0, kind: input, shape index: {}]   ;;  %s511_s1 = inlined_call_operand.hbm [shape: f32[8,8], index: 1, kind: input, shape index: {}]   ;;  %s512_s2 = inlined_call_operand.hbm [shape: f32[16,128], index: 2, kind: input, shape index: {}]   ;;  %s513_s3 = inlined_call_operand.hbm [shape: f32[8,128], index: 3, kind: input, shape index: {}]   ;;  %s514_s4 = inlined_call_operand.hbm [shape: f32[1,128], index: 4, kind: input, shape index: {}]   ;;  %s515_s5 = inlined_call_operand.hbm [shape: f32[128,128], index: 5, kind: input, shape index: {}]   ;;  %s516_s6 = inlined_call_operand.vmem [shape: f32[1,128], index: 6, kind: input, shape index: {}]   ;;  %s517_s7 = inlined_call_operand.vmem [shape: f32[2,128], index: 7, kind: input, shape index: {}]   ;;  %s518_s8 = inlined_call_operand.vmem [shape: f32[2,1], index: 8, kind: input, shape index: {}]   ;;  %s519_s9 = inlined_call_operand.vmem [shape: f32[2,8], index: 9, kind: output, shape index: {}]  }
   0x1   :  { %15 = vsyncpa [#allocation5], 0 }
   0x2   :  { %16 = vsyncpa [#allocation8], 0  ;;  %s34_s11 = sshll.u32 %s511_s1, 4  ;;  %s35_s11 = int_to_ptr.hbm [resolvable:$true] %s34_s11 }
   0x3   :  { %17 = vsyncpa [#allocation11], 0  ;;  %s421_s12 = smov [#allocation4]   ;;  %s58_s16 = sshll.u32 %s513_s3, 4  ;;  %s59_s16 = int_to_ptr.hbm [resolvable:$true] %s58_s16 }
   0x4   :  { %s36_s13 = sshll.u32 %s421_s12, 4  ;;  %s422_s17 = smov [#allocation7]   ;;  %s37_s13 = int_to_ptr.vmem [resolvable:$true] %s36_s13 }
   0x5   :  { %39 = dma.hbm_to_vmem [thread:$0]  %s35_s11, 128, %s37_s13, [#allocation5]  }
   0x6   :  { %s60_s18 = sshll.u32 %s422_s17, 4  ;;  %s23_s21 = sshll.u32 %s510_s0, 4  ;;  %s61_s18 = int_to_ptr.vmem [resolvable:$true] %s60_s18  ;;  %s24_s21 = int_to_ptr.hbm [resolvable:$true] %s23_s21 }
   0x7   :  { %63 = dma.hbm_to_vmem [thread:$0]  %s59_s16, 128, %s61_s18, [#allocation8]  }
   0x8   :  { %s44_s23 = sshll.u32 %s512_s2, 4  ;;  %s423_s24 = smov [#allocation2]   ;;  %s45_s23 = int_to_ptr.hbm [resolvable:$true] %s44_s23 }
   0x9   :  { %s25_s25 = sshll.u32 %s423_s24, 4  ;;  %s424_s3 = smov [#allocation6]   ;;  %s26_s25 = int_to_ptr.vmem [resolvable:$true] %s25_s25 }
   0xa   :  { %28 = dma.hbm_to_vmem [thread:$0]  %s24_s21, 128, %s26_s25, [#allocation3]  }
   0xb   :  { %s46_s26 = sshll.u32 %s424_s3, 4  ;;  %s425_s27 = smov 128   ;;  %s47_s26 = int_to_ptr.vmem [resolvable:$true] %s46_s26 }
   0xc   :  { %s426_s28 = smov 8   ;;  %s69_s30 = sshll.u32 %s514_s4, 4  ;;  %s70_s30 = int_to_ptr.hbm [resolvable:$true] %s69_s30 }
   0xd   :  { %52 = dma.hbm_to_vmem [thread:$0]  %s45_s23, 256, %s47_s26, [#allocation5], %s425_s27, %s425_s27, %s426_s28  }
   0xe   :  { %s427_s10 = smov [#allocation9]   ;;  %s79_s13 = sshll.u32 %s515_s5, 4  ;;  %s80_s13 = int_to_ptr.hbm [resolvable:$true] %s79_s13 }
   0xf   :  { %s71_s11 = sshll.u32 %s427_s10, 4  ;;  %s428_s14 = smov [#allocation10]   ;;  %s72_s11 = int_to_ptr.vmem [resolvable:$true] %s71_s11 }
  0x10   :  { %74 = dma.hbm_to_vmem [thread:$0]  %s70_s30, 16, %s72_s11, [#allocation8]  }
  0x11   :  { %s81_s15 = sshll.u32 %s428_s14, 4  ;;  %s82_s15 = int_to_ptr.vmem [resolvable:$true] %s81_s15 }
  0x12   :  { %87 = dma.hbm_to_vmem [thread:$0]  %s80_s13, 2048, %s82_s15, [#allocation11], %s425_s27, %s425_s27, %s426_s28  }
  0x13   :  { %413 = dma.done.wait [#allocation3], 128  }
  0x14   :  { %414 = vsyncadd [#allocation3], 4294967168 }
  0x15   :  { %415 = dma.done.wait [#allocation5], 384  }
  0x16   :  { %416 = vsyncadd [#allocation5], 4294966912 }
  0x17   :  { %417 = dma.done.wait [#allocation8], 144  }
  0x18   :  { %418 = vsyncadd [#allocation8], 4294967152 }
  0x19   :  { %419 = dma.done.wait [#allocation11], 2048  }
  0x1a   :  { %420 = vsyncadd [#allocation11], 4294965248  ;;  %vm123_vm0 = vcmask 64512   ;;  %v120_v0 = vld [vmem:[#allocation6 + $0x8] sm:$0xff]  ;;  %v122_v1 = vld [vmem:[#allocation7] sm:$0xff]  ;;  %vm147_vm1 = vcmask 130048  }
  0x1b   :  { %v119_v2 = vld [vmem:[#allocation6] sm:$0xff]  ;;  %165 = vmatpush.msra.mxu1 %v120_v0  ;;  %142 = vmatpush.msra.mxu0 %v122_v1  ;;  %v121_v3 = vld [vmem:[#allocation4] sm:$0xff]  ;;  %v118_v4 = vld [vmem:[#allocation2] sm:$0xff]  ;;  %v429_v28 = vmov 0   ;;  %vm245_vm2 = vcmask 58368  }
  0x1c   :  { %v192_v5 = vld [vmem:[#allocation10 + $0x78] sm:$0xff]  ;;  %255 = vmatmul.msk.f32.vlgmr.msra.gmra.mxu0 %vm123_vm0, %v121_v3  ;;  %v191_v6 = vld [vmem:[#allocation10 + $0x70] sm:$0xff]  ;;  %v190_v7 = vld [vmem:[#allocation10 + $0x68] sm:$0xff]  ;;  %266 = vset.pattern.permute.xlu0 %v429_v28 }
  0x1d   :  { %197 = vmatpush.msra.mxu2 %v192_v5  ;;  %166 = vmatpush.msra.mxu1 %v119_v2  ;;  %v189_v8 = vld [vmem:[#allocation10 + $0x60] sm:$0xff]  ;;  %v188_v9 = vld [vmem:[#allocation10 + $0x58] sm:$0xff]  ;;  %v187_v10 = vld [vmem:[#allocation10 + $0x50] sm:$0xff] }
  0x1e   :  { %256 = vmatmul.msk.f32.vlgmr.msra.gmra.mxu1 %vm147_vm1, %v118_v4  ;;  %v186_v11 = vld [vmem:[#allocation10 + $0x48] sm:$0xff]  ;;  %v185_v12 = vld [vmem:[#allocation10 + $0x40] sm:$0xff]  ;;  %v184_v13 = vld [vmem:[#allocation10 + $0x38] sm:$0xff] }
  0x1f   :  { %198 = vmatpush.msra.mxu2 %v191_v6  ;;  %v183_v14 = vld [vmem:[#allocation10 + $0x30] sm:$0xff]  ;;  %v182_v15 = vld [vmem:[#allocation10 + $0x28] sm:$0xff]  ;;  %v181_v16 = vld [vmem:[#allocation10 + $0x20] sm:$0xff] }
  0x20   :  { %v180_v17 = vld [vmem:[#allocation10 + $0x18] sm:$0xff]  ;;  %v179_v18 = vld [vmem:[#allocation10 + $0x10] sm:$0xff]  ;;  %v178_v19 = vld [vmem:[#allocation10 + $0x8] sm:$0xff] }
  0x21   :  { %199 = vmatpush.msra.mxu2 %v190_v7  ;;  %v177_v20 = vld [vmem:[#allocation10] sm:$0xff]  ;;  %v267_v22 = vld [vmem:[#allocation9] ss:$0 sm:$0xff]  ;;  %v219_v27 = vld [vmem:[%s518_s8] sm:$0x3] }
  0x22   :  { %222 = vperm.xlu0 %266, %v219_v27   ;;  %v268_v29 = vld [vmem:[%s516_s6] ss:$0 sm:$0xff] }
  0x23   :  { %200 = vmatpush.msra.mxu2 %v189_v8  ;;  %v218_v33 = vld [vmem:[%s517_s7] sm:$0x3] }
  0x25   :  { %201 = vmatpush.msra.mxu2 %v188_v9 }
  0x27   :  { %202 = vmatpush.msra.mxu2 %v187_v10 }
  0x29   :  { %203 = vmatpush.msra.mxu2 %v186_v11 }
  0x2b   :  { %204 = vmatpush.msra.mxu2 %v185_v12 }
  0x2d   :  { %205 = vmatpush.msra.mxu2 %v184_v13 }
  0x2f   :  { %206 = vmatpush.msra.mxu2 %v183_v14 }
  0x31   :  { %207 = vmatpush.msra.mxu2 %v182_v15 }
  0x33   :  { %208 = vmatpush.msra.mxu2 %v181_v16 }
  0x35   :  { %209 = vmatpush.msra.mxu2 %v180_v17 }
  0x37   :  { %210 = vmatpush.msra.mxu2 %v179_v18 }
  0x39   :  { %211 = vmatpush.msra.mxu2 %v178_v19 }
  0x3b   :  { %212 = vmatpush.msra.mxu2 %v177_v20 }
  0x94   :  { %v223_v34 = vpop.permute.xlu0 %222 }
  0x99   :  { %v144_v21 = vpop.f32.mrf.mxu0 }
  0x9b   :  { %v168_v23 = vpop.f32.mrf.mxu1 }
  0x9c   :  { %v169_v24 = vadd.f32 %v168_v23, %v144_v21 }
  0x9e   :  { %v175_v25 = vadd.f32 %v267_v22, %v169_v24 }
  0xa0   :  { %v176_v26 = vmax.f32 %v175_v25, 0.0 }
  0xa2   :  { %213 = vmatmul.f32.vlgmr.msra.gmra.mxu2 %v176_v26 }
 0x125   :  { %v214_v30 = vpop.f32.mrf.mxu2 }
 0x126   :  { %v215_v31 = vadd.f32 %v268_v29, %v214_v30 }
 0x128   :  { %v217_v32 = vmax.f32 %v215_v31, 0.0 }
 0x12a   :  { %240 = vmatpush.xpose.msra.mxu3 %v217_v32 }
 0x12d   :  { %241 = vmatmul.f32.vlgmr.msra.gmra.mxu3 %v218_v33 }
 0x1b0   :  { %v242_v35 = vpop.f32.mrf.mxu3 }
 0x1b1   :  { %v243_v36 = vadd.f32 %v242_v35, %v223_v34 }
 0x1b3   :  { %246 = vst.msk [vmem:[%s519_s9] sm:$0x3] %vm245_vm2, %v243_v36 }
 0x1b4   :  { %251 = vsyncpa [#allocation3], 1 }
 0x1b5   :  { %252 = vsyncpa [#allocation5], 1 }
 0x1b6   :  { %253 = vsyncpa [#allocation8], 1 }
 0x1b7   :  { %254 = vsyncpa [#allocation11], 1 }

</bundles_post_ra>
